<compile_context>
chip_gen: v7x
topology: tpu7x:2x2x1
jax: 0.10.0
libtpu: 0.0.40
codegen_flags: <defaults>
</compile_context>

<pallas_src>
import jax
import jax.numpy as jnp
from jax.experimental import pallas as pl
from jax.experimental.pallas import tpu as pltpu

_LANE = 128  # TPU lane width


def mlp_kernel(x_ref, w1_ref, b1_ref, w2_ref, b2_ref, w3_ref, b3_ref, o_ref):
    """One batch tile of the fused 3-layer MLP.

    x_ref : [tb, Dp]   bf16   (Dp = input_size padded to a lane multiple)
    w1_ref: [Dp, 128]  bf16
    b1_ref: [1, 128]   f32
    w2_ref: [128, 256] bf16
    b2_ref: [1, 256]   f32
    w3_ref: [1, 256]   f32    (fc3 weight as a row; fc3 runs on VPU+XLU)
    b3_ref: [1, 1]     f32
    o_ref : [tb, 128]  f32    (lane-dense; column 0 holds the real output)
    """
    # fc1 + ReLU (bf16 MXU inputs, f32 accumulation; elementwise work in f32)
    h1 = jnp.dot(x_ref[...], w1_ref[...], preferred_element_type=jnp.float32)
    h1 = jnp.maximum(h1 + b1_ref[...], 0.0)

    # fc2 + ReLU
    h2 = jnp.dot(h1.astype(jnp.bfloat16), w2_ref[...],
                 preferred_element_type=jnp.float32)
    h2 = jnp.maximum(h2 + b2_ref[...], 0.0)

    # fc3: N=1 matmul would waste 255/256 MXU output columns — do it as an
    # elementwise multiply (VPU) + cross-lane reduction (XLU) instead.
    logits = jnp.sum(h2 * w3_ref[...], axis=-1, keepdims=True) + b3_ref[...]
    probs = jax.nn.sigmoid(logits)                       # [tb, 1] f32

    # Lane-dense store: replicate across 128 lanes; wrapper slices [:, :1].
    o_ref[...] = jnp.broadcast_to(probs, o_ref.shape)


def mlp_forward(x, params, *, tile_b=128):
    """x: [B, input_size] f32. Returns [B, 1] f32 sigmoid probabilities."""
    w1, b1, w2, b2, w3, b3 = params
    B, D = x.shape

    # --- pad feature dim to a lane multiple (zero x columns / zero w1 rows) ---
    Dp = pl.cdiv(D, _LANE) * _LANE
    if Dp != D:
        x = jnp.pad(x, ((0, 0), (0, Dp - D)))
        w1 = jnp.pad(w1, ((0, Dp - D), (0, 0)))

    # --- batch tile: whole batch in one step when small, else tile_b rows ---
    tb = B if B <= tile_b else tile_b
    Bp = pl.cdiv(B, tb) * tb
    if Bp != B:
        x = jnp.pad(x, ((0, Bp - B), (0, 0)))

    # bf16 MXU inputs (accumulation stays f32 inside the kernel).
    x_bf = x.astype(jnp.bfloat16)
    w1_bf = w1.astype(jnp.bfloat16)
    w2_bf = w2.astype(jnp.bfloat16)
    w3_row = w3.reshape(1, -1).astype(jnp.float32)        # [1, 256]

    grid = (Bp // tb,)

    # Batch axis is tiled; weights/biases are resident (constant index_map,
    # DMA'd once — their VMEM footprint is negligible at these sizes).
    # TODO(synk): for very large input_size on v7x (64 MiB VMEM), split the
    # fc1 contraction over a K grid axis with an f32 accumulator scratch.
    in_specs = [
        pl.BlockSpec((tb, Dp), lambda i: (i, 0)),          # x  (tiled on batch)
        pl.BlockSpec(w1_bf.shape, lambda i: (0, 0)),       # w1 [Dp, 128]
        pl.BlockSpec(b1.shape, lambda i: (0, 0)),          # b1 [1, 128]
        pl.BlockSpec(w2_bf.shape, lambda i: (0, 0)),       # w2 [128, 256]
        pl.BlockSpec(b2.shape, lambda i: (0, 0)),          # b2 [1, 256]
        pl.BlockSpec(w3_row.shape, lambda i: (0, 0)),      # w3 [1, 256]
        pl.BlockSpec(b3.shape, lambda i: (0, 0)),          # b3 [1, 1]
    ]
    out_specs = pl.BlockSpec((tb, _LANE), lambda i: (i, 0))

    out = pl.pallas_call(
        mlp_kernel,
        out_shape=jax.ShapeDtypeStruct((Bp, _LANE), jnp.float32),
        grid=grid,
        in_specs=in_specs,
        out_specs=out_specs,
        compiler_params=pltpu.CompilerParams(
            dimension_semantics=("parallel",),
            vmem_limit_bytes=64 << 20,
        ),
    )(x_bf, w1_bf, b1, w2_bf, b2, w3_row, b3)

    # Undo lane-dense padding / batch padding.
    return out[:B, :1]


def init_params(key, input_size):
    """Deterministic init mirroring nn.Linear shapes (stored transposed)."""
    k1, k2, k3, k4, k5, k6 = jax.random.split(key, 6)

    def lin(kw, kb, fan_in, fan_out):
        # Kaiming-uniform-ish bound like PyTorch's default Linear init.
        bound = 1.0 / jnp.sqrt(fan_in)
        w = jax.random.uniform(kw, (fan_in, fan_out), jnp.float32, -bound, bound)
        b = jax.random.uniform(kb, (1, fan_out), jnp.float32, -bound, bound)
        return w, b

    w1, b1 = lin(k1, k2, input_size, 128)
    w2, b2 = lin(k3, k4, 128, 256)
    w3, b3 = lin(k5, k6, 256, 1)
    return (w1, b1, w2, b2, w3, b3)


def reference_forward(x, params):
    """Pure-JAX f32 reference for correctness checking."""
    w1, b1, w2, b2, w3, b3 = params
    h = jnp.maximum(x @ w1 + b1, 0.0)
    h = jnp.maximum(h @ w2 + b2, 0.0)
    return jax.nn.sigmoid(h @ w3 + b3)


if __name__ == "__main__":
    key = jax.random.PRNGKey(0)
    kx, kp = jax.random.split(key)

    batch = 256          # 2 grid steps of 128 rows
    input_size = 64      # padded to 128 lanes inside the wrapper

    x = jax.random.normal(kx, (batch, input_size), jnp.float32)
    params = init_params(kp, input_size)

    fwd = jax.jit(lambda xx, pp: mlp_forward(xx, pp))
    out = fwd(x, params)
    out = jax.block_until_ready(out)

    ref = reference_forward(x, params)
    assert out.shape == (batch, 1)
    # bf16 MXU inputs -> looser tolerance than pure-f32 (outputs are in [0,1]).
    assert jnp.allclose(out, ref, atol=2e-2, rtol=0.0), "mismatch vs reference"

    print("KERNEL_OK")
</pallas_src>

<mosaic_0001>
module attributes {stable_mosaic.version = 11 : i64} {
  func.func @mlp_kernel(%arg0: i32, %arg1: memref<128x128xbf16, #tpu.memory_space<vmem>>, %arg2: memref<128x128xbf16, #tpu.memory_space<vmem>>, %arg3: memref<1x128xf32, #tpu.memory_space<vmem>>, %arg4: memref<128x256xbf16, #tpu.memory_space<vmem>>, %arg5: memref<1x256xf32, #tpu.memory_space<vmem>>, %arg6: memref<1x256xf32, #tpu.memory_space<vmem>>, %arg7: memref<1x1xf32, #tpu.memory_space<vmem>>, %arg8: memref<128x128xf32, #tpu.memory_space<vmem>>) attributes {dimension_semantics = [#tpu.dimension_semantics<parallel>], iteration_bounds = array<i64: 2>, scalar_prefetch = 0 : i64, scratch_operands = 0 : i64, tpu.core_type = #tpu.core_type<tc>, window_params = [{transform_indices = @transform_0, window_bounds = array<i64: 128, 128>}, {pipeline_mode = #tpu.pipeline_mode<synchronous>, transform_indices = @transform_1, window_bounds = array<i64: 128, 128>}, {pipeline_mode = #tpu.pipeline_mode<synchronous>, transform_indices = @transform_2, window_bounds = array<i64: 1, 128>}, {pipeline_mode = #tpu.pipeline_mode<synchronous>, transform_indices = @transform_3, window_bounds = array<i64: 128, 256>}, {pipeline_mode = #tpu.pipeline_mode<synchronous>, transform_indices = @transform_4, window_bounds = array<i64: 1, 256>}, {pipeline_mode = #tpu.pipeline_mode<synchronous>, transform_indices = @transform_5, window_bounds = array<i64: 1, 256>}, {pipeline_mode = #tpu.pipeline_mode<synchronous>, transform_indices = @transform_6, window_bounds = array<i64: 1, 1>}, {transform_indices = @transform_7, window_bounds = array<i64: 128, 128>}]} {
    %c0 = arith.constant 0 : index
    %c0_0 = arith.constant 0 : index
    %0 = vector.load %arg1[%c0, %c0_0] : memref<128x128xbf16, #tpu.memory_space<vmem>>, vector<128x128xbf16>
    %c0_1 = arith.constant 0 : index
    %c0_2 = arith.constant 0 : index
    %1 = vector.load %arg2[%c0_1, %c0_2] : memref<128x128xbf16, #tpu.memory_space<vmem>>, vector<128x128xbf16>
    %cst = arith.constant dense<0.000000e+00> : vector<128x128xf32>
    %2 = tpu.matmul %0, %1, %cst {dimension_numbers = #tpu.dot_dimension_numbers<[1], [0], [0], [1], [0, 0, 1, 1], [], []>} : vector<128x128xbf16>, vector<128x128xbf16>, vector<128x128xf32> -> vector<128x128xf32>
    %c0_3 = arith.constant 0 : index
    %c0_4 = arith.constant 0 : index
    %3 = vector.load %arg3[%c0_3, %c0_4] : memref<1x128xf32, #tpu.memory_space<vmem>>, vector<1x128xf32>
    %4 = vector.broadcast %3 : vector<1x128xf32> to vector<128x128xf32>
    %5 = arith.addf %2, %4 : vector<128x128xf32>
    %cst_5 = arith.constant 0.000000e+00 : f32
    %6 = vector.broadcast %cst_5 : f32 to vector<128x128xf32>
    %7 = arith.maximumf %5, %6 : vector<128x128xf32>
    %8 = arith.truncf %7 : vector<128x128xf32> to vector<128x128xbf16>
    %c0_6 = arith.constant 0 : index
    %c0_7 = arith.constant 0 : index
    %9 = vector.load %arg4[%c0_6, %c0_7] : memref<128x256xbf16, #tpu.memory_space<vmem>>, vector<128x256xbf16>
    %cst_8 = arith.constant dense<0.000000e+00> : vector<128x256xf32>
    %10 = tpu.matmul %8, %9, %cst_8 {dimension_numbers = #tpu.dot_dimension_numbers<[1], [0], [0], [1], [0, 0, 1, 1], [], []>} : vector<128x128xbf16>, vector<128x256xbf16>, vector<128x256xf32> -> vector<128x256xf32>
    %c0_9 = arith.constant 0 : index
    %c0_10 = arith.constant 0 : index
    %11 = vector.load %arg5[%c0_9, %c0_10] : memref<1x256xf32, #tpu.memory_space<vmem>>, vector<1x256xf32>
    %12 = vector.broadcast %11 : vector<1x256xf32> to vector<128x256xf32>
    %13 = arith.addf %10, %12 : vector<128x256xf32>
    %cst_11 = arith.constant 0.000000e+00 : f32
    %14 = vector.broadcast %cst_11 : f32 to vector<128x256xf32>
    %15 = arith.maximumf %13, %14 : vector<128x256xf32>
    %c0_12 = arith.constant 0 : index
    %c0_13 = arith.constant 0 : index
    %16 = vector.load %arg6[%c0_12, %c0_13] : memref<1x256xf32, #tpu.memory_space<vmem>>, vector<1x256xf32>
    %17 = vector.broadcast %16 : vector<1x256xf32> to vector<128x256xf32>
    %18 = arith.mulf %15, %17 : vector<128x256xf32>
    %cst_14 = arith.constant dense<0.000000e+00> : vector<128xf32>
    %19 = vector.multi_reduction <add>, %18, %cst_14 [1] : vector<128x256xf32> to vector<128xf32>
    %20 = vector.shape_cast %19 : vector<128xf32> to vector<128x1xf32>
    %c0_15 = arith.constant 0 : index
    %c0_16 = arith.constant 0 : index
    %21 = vector.load %arg7[%c0_15, %c0_16] : memref<1x1xf32, #tpu.memory_space<vmem>>, vector<1x1xf32>
    %22 = vector.broadcast %21 : vector<1x1xf32> to vector<128x1xf32>
    %23 = arith.addf %20, %22 : vector<128x1xf32>
    %24 = arith.negf %23 : vector<128x1xf32>
    %25 = math.exp %24 : vector<128x1xf32>
    %cst_17 = arith.constant 1.000000e+00 : f32
    %26 = vector.broadcast %cst_17 : f32 to vector<128x1xf32>
    %27 = arith.addf %26, %25 : vector<128x1xf32>
    %28 = arith.divf %26, %27 : vector<128x1xf32>
    %29 = vector.shape_cast %28 : vector<128x1xf32> to vector<128x1xf32>
    %30 = vector.broadcast %29 : vector<128x1xf32> to vector<128x128xf32>
    %c0_18 = arith.constant 0 : index
    %c0_19 = arith.constant 0 : index
    %31 = vector.load %arg8[%c0_18, %c0_19] : memref<128x128xf32, #tpu.memory_space<vmem>>, vector<128x128xf32>
    tpu.vector_store %arg8[%c0_18, %c0_19], %30 {strides = array<i32>} : memref<128x128xf32, #tpu.memory_space<vmem>>, vector<128x128xf32>,
    return
  }
  func.func @transform_0(%arg0: i32) -> (i32, i32) {
    %c0_i32 = arith.constant 0 : i32
    %c0_i32_0 = arith.constant 0 : i32
    return %arg0, %c0_i32 : i32, i32
  }
  func.func @transform_1(%arg0: i32) -> (i32, i32) {
    %c0_i32 = arith.constant 0 : i32
    %c0_i32_0 = arith.constant 0 : i32
    %c0_i32_1 = arith.constant 0 : i32
    return %c0_i32, %c0_i32_0 : i32, i32
  }
  func.func @transform_2(%arg0: i32) -> (i32, i32) {
    %c0_i32 = arith.constant 0 : i32
    %c0_i32_0 = arith.constant 0 : i32
    %c0_i32_1 = arith.constant 0 : i32
    return %c0_i32, %c0_i32_0 : i32, i32
  }
  func.func @transform_3(%arg0: i32) -> (i32, i32) {
    %c0_i32 = arith.constant 0 : i32
    %c0_i32_0 = arith.constant 0 : i32
    %c0_i32_1 = arith.constant 0 : i32
    return %c0_i32, %c0_i32_0 : i32, i32
  }
  func.func @transform_4(%arg0: i32) -> (i32, i32) {
    %c0_i32 = arith.constant 0 : i32
    %c0_i32_0 = arith.constant 0 : i32
    %c0_i32_1 = arith.constant 0 : i32
    return %c0_i32, %c0_i32_0 : i32, i32
  }
  func.func @transform_5(%arg0: i32) -> (i32, i32) {
    %c0_i32 = arith.constant 0 : i32
    %c0_i32_0 = arith.constant 0 : i32
    %c0_i32_1 = arith.constant 0 : i32
    return %c0_i32, %c0_i32_0 : i32, i32
  }
  func.func @transform_6(%arg0: i32) -> (i32, i32) {
    %c0_i32 = arith.constant 0 : i32
    %c0_i32_0 = arith.constant 0 : i32
    %c0_i32_1 = arith.constant 0 : i32
    return %c0_i32, %c0_i32_0 : i32, i32
  }
  func.func @transform_7(%arg0: i32) -> (i32, i32) {
    %c0_i32 = arith.constant 0 : i32
    %c0_i32_0 = arith.constant 0 : i32
    return %arg0, %c0_i32 : i32, i32
  }
}

</mosaic_0001>

<bundles_post_ra>
// kernel: _lambda_.1
= control target key start
LH: loop header
LB: loop body
LE: loop exit
PB: predicated region body
PF: predicated region fallthrough
CT: control target
= control target key end

     0   :  { %s2410_s0 = inlined_call_operand.hbm [shape: bf16[256,128], index: 0, kind: input, shape index: {}]   ;;  %s2411_s1 = inlined_call_operand.hbm [shape: bf16[128,128], index: 1, kind: input, shape index: {}]   ;;  %s2412_s2 = inlined_call_operand.hbm [shape: f32[1,128], index: 2, kind: input, shape index: {}]   ;;  %s2413_s3 = inlined_call_operand.hbm [shape: bf16[128,256], index: 3, kind: input, shape index: {}]   ;;  %s2414_s4 = inlined_call_operand.hbm [shape: f32[1,256], index: 4, kind: input, shape index: {}]   ;;  %s2415_s5 = inlined_call_operand.hbm [shape: f32[1,256], index: 5, kind: input, shape index: {}]   ;;  %s2416_s6 = inlined_call_operand.<no memory space> [shape: f32[1,1], index: 6, kind: input, shape index: {}]   ;;  %s2417_s7 = inlined_call_operand.hbm [shape: f32[256,128], index: 7, kind: output, shape index: {}]  }
   0x1   :  { %v12_v0 = vstv %s2416_s6 }
   0x2   :  { %13 = vst [vmem:[#allocation2] sm:$0x1] %v12_v0 }
   0x3   :  { %14 = vsyncpa [#allocation4], 0 }
   0x4   :  { %16 = vsyncpa [#allocation4 + $0x1], 0 }
   0x5   :  { %17 = vsyncpa [#allocation7], 0 }
   0x6   :  { %18 = vsyncpa [#allocation10], 0 }
   0x7   :  { %19 = vsyncpa [#allocation13], 0 }
   0x8   :  { %20 = vsyncpa [#allocation5], 0 }
   0x9   :  { %22 = vsyncpa [#allocation5 + $0x1], 0  ;;  %s1977_s26 = smov 0   ;;  %s1979_s27 = smov 0  }
   0xa   :  { %s1981_s28 = smov 0   ;;  %s1983_s29 = smov 0  }
   0xb LB: > { %s1920_s6 = smov [#allocation6]   ;;  %s1998_s8 = sadd.s32 4294967295, %s1918_s29   ;;  %s1918_s29 = sphi %s1983_s29, %s2442_s29   ;;  %s1914_s28 = sphi %s1981_s28, %s2441_s28   ;;  %s1910_s27 = sphi %s1979_s27, %s2440_s27   ;;  %s1906_s26 = sphi %s1977_s26, %s2439_s26  }
   0xc   : > { %s223_s30 = sshll.u32 %s1920_s6, 4  ;;  %p1321_p0 = scmp.ge.s32.totalorder %s1918_s29, 1  ;;  %s2003_s30 = int_to_ptr.vmem [resolvable:$true] %s223_s30 }
   0xd   : > { %p2418_p1 = scmp.eq.s32.totalorder %s1998_s8, 0  ;;  %p211_p2 = scmp.lt.s32.totalorder %s1918_s29, 3 }
   0xe   : > { %s1921_s10 = smov [#allocation9]   ;;  %s1922_s13 = smov [#allocation8]  }
   0xf   : > { %p2005_p3 = pnand %p1321_p0, %p211_p2  ;;  %s247_s11 = sshll.u32 %s1921_s10, 4  ;;  %s2018_s11 = int_to_ptr.vmem [resolvable:$true] %s247_s11 }
  0x10   : > { %s2020_s14 = sshll.u32 %s1922_s13, 4  ;;  %s1670_s17 = scalar_lea.hbm %s2411_s1, 1024  ;;  %s238_s14 = int_to_ptr.vmem [resolvable:$true] %s2020_s14 }
  0x11   : > { %s2421_s9 = scalar_select %p2005_p3, 1, 0 }
  0x12   : > { %p1484_p5 = pneg %p2005_p3  ;;  %p1671_p7 = scmp.ne.s32.totalorder %s2411_s1, %s1670_s17 }
  0x13   : > { %p1677_p11 = scmp.lt.u32.totalorder %s1670_s17, %s2411_s1 }
  0x14   : > { %p2014_p6 = pnand %p1484_p5, %p2418_p1 }
  0x16   : > { %p2030_p8 = pneg %p2014_p6 }
  0x18   : > { %p1673_p9 = pnand %p2030_p8, %p1671_p7 }
  0x1a   : > { %p1674_p10 = pneg %p1673_p9 }
  0x1c   : > { %p1679_p12 = pnand %p1677_p11, %p1674_p10 }
  0x1e   : > { %1682 = shalt.err (!%p1679_p12)
}
  0x1f   : > { %s1683_s23 = scalar_lea.vmem %s2003_s30, 1024  ;;  %p1691_p5 = scmp.lt.s32.totalorder %s2003_s30, %s2003_s30 }
  0x20   : > { %p1684_p13 = scmp.ne.s32.totalorder %s2003_s30, %s1683_s23  ;;  %p1692_p4 = scmp.lt.s32.totalorder %s1683_s23, %s1683_s23 }
  0x22   : > { %p1686_p0 = pnand %p1684_p13, %p2030_p8  ;;  %p1693_p7 = por %p1692_p4, %p1691_p5 }
  0x24   : > { %p1687_p2 = pneg %p1686_p0 }
  0x26   : > { %p1694_p9 = pnand %p1693_p7, %p1687_p2 }
  0x28   : > { %1697 = shalt.err (!%p1694_p9)
}
  0x29   : > { %s1923_s24 = smov 64   ;;  %s1924_s25 = smov 4  }
  0x2a   : > { %1487 = dma.hbm_to_vmem [thread:$0]  (!%p2014_p6), %s2411_s1, 1024, %s2003_s30, [#allocation7], %s1923_s24, %s1923_s24, %s1924_s25  }
  0x2b   : > { %s1698_s16 = scalar_lea.hbm %s2413_s3, 2048 }
  0x2c   : > { %p1699_p4 = scmp.ne.s32.totalorder %s2413_s3, %s1698_s16  ;;  %p1705_p12 = scmp.lt.u32.totalorder %s1698_s16, %s2413_s3 }
  0x2e   : > { %p1701_p10 = pnand %p1699_p4, %p2030_p8 }
  0x30   : > { %p1702_p11 = pneg %p1701_p10 }
  0x32   : > { %p1707_p13 = pnand %p1705_p12, %p1702_p11 }
  0x34   : > { %1710 = shalt.err (!%p1707_p13)
}
  0x35   : > { %s1711_s30 = scalar_lea.vmem %s2018_s11, 2048  ;;  %p1719_p7 = scmp.lt.s32.totalorder %s2018_s11, %s2018_s11 }
  0x36   : > { %p1712_p0 = scmp.ne.s32.totalorder %s2018_s11, %s1711_s30  ;;  %p1720_p9 = scmp.lt.s32.totalorder %s1711_s30, %s1711_s30 }
  0x38   : > { %p1714_p2 = pnand %p1712_p0, %p2030_p8  ;;  %p1721_p4 = por %p1720_p9, %p1719_p7 }
  0x3a   : > { %p1715_p5 = pneg %p1714_p2 }
  0x3c   : > { %p1722_p10 = pnand %p1721_p4, %p1715_p5 }
  0x3e   : > { %1725 = shalt.err (!%p1722_p10)
}
  0x3f   : > { %s1925_s22 = smov 128   ;;  %s1926_s23 = smov 8  }
  0x40   : > { %1493 = dma.hbm_to_vmem [thread:$0]  (!%p2014_p6), %s2413_s3, 2048, %s2018_s11, [#allocation10], %s1925_s22, %s1925_s22, %s1926_s23  }
  0x41   : > { %s1726_s16 = scalar_lea.hbm %s2412_s2, 16 }
  0x42   : > { %p1727_p11 = scmp.ne.s32.totalorder %s2412_s2, %s1726_s16  ;;  %p1733_p0 = scmp.lt.u32.totalorder %s1726_s16, %s2412_s2 }
  0x44   : > { %p1729_p12 = pnand %p1727_p11, %p2030_p8 }
  0x46   : > { %p1730_p13 = pneg %p1729_p12 }
  0x48   : > { %p1735_p2 = pnand %p1733_p0, %p1730_p13 }
  0x4a   : > { %1738 = shalt.err (!%p1735_p2)
}
  0x4b   : > { %s1739_s30 = scalar_lea.vmem %s238_s14, 16  ;;  %s1746_s11 = scalar_lea.vmem %s238_s14, 32 }
  0x4c   : > { %p1740_p5 = scmp.ne.s32.totalorder %s238_s14, %s1739_s30  ;;  %p1747_p4 = scmp.lt.s32.totalorder %s238_s14, %s238_s14 }
  0x4d   : > { %p1748_p10 = scmp.lt.s32.totalorder %s1746_s11, %s1739_s30 }
  0x4e   : > { %p1742_p7 = pnand %p1740_p5, %p2030_p8 }
  0x4f   : > { %p1749_p1 = por %p1748_p10, %p1747_p4 }
  0x50   : > { %p1743_p9 = pneg %p1742_p7 }
  0x52   : > { %p1750_p3 = pnand %p1749_p1, %p1743_p9 }
  0x54   : > { %1753 = shalt.err (!%p1750_p3)
}
  0x55   : > { %1490 = dma.hbm_to_vmem [thread:$0]  (!%p2014_p6), %s2412_s2, 16, %s238_s14, [#allocation7]  }
  0x56   : > { %s1927_s6 = smov [#allocation11]   ;;  %s1928_s13 = smov [#allocation12]  }
  0x57   : > { %s261_s10 = sshll.u32 %s1927_s6, 4  ;;  %s272_s15 = sshll.u32 %s1928_s13, 4  ;;  %s262_s10 = int_to_ptr.vmem [resolvable:$true] %s261_s10  ;;  %s273_s15 = int_to_ptr.vmem [resolvable:$true] %s272_s15 }
  0x58   : > { %s1754_s18 = scalar_lea.hbm %s2414_s4, 32 }
  0x59   : > { %p1755_p1 = scmp.ne.s32.totalorder %s2414_s4, %s1754_s18  ;;  %p1761_p12 = scmp.lt.u32.totalorder %s1754_s18, %s2414_s4 }
  0x5b   : > { %p1757_p3 = pnand %p1755_p1, %p2030_p8 }
  0x5d   : > { %p1758_p11 = pneg %p1757_p3 }
  0x5f   : > { %p1763_p13 = pnand %p1761_p12, %p1758_p11 }
  0x61   : > { %1766 = shalt.err (!%p1763_p13)
}
  0x62   : > { %s1767_s14 = scalar_lea.vmem %s262_s10, 32  ;;  %p1775_p7 = scmp.lt.s32.totalorder %s262_s10, %s262_s10 }
  0x63   : > { %p1768_p0 = scmp.ne.s32.totalorder %s262_s10, %s1767_s14  ;;  %p1776_p9 = scmp.lt.s32.totalorder %s1767_s14, %s1767_s14 }
  0x65   : > { %p1770_p2 = pnand %p1768_p0, %p2030_p8  ;;  %p1777_p4 = por %p1776_p9, %p1775_p7 }
  0x67   : > { %p1771_p5 = pneg %p1770_p2 }
  0x69   : > { %p1778_p10 = pnand %p1777_p4, %p1771_p5 }
  0x6b   : > { %1781 = shalt.err (!%p1778_p10)
}
  0x6c   : > { %1496 = dma.hbm_to_vmem [thread:$0]  (!%p2014_p6), %s2414_s4, 32, %s262_s10, [#allocation10]  }
  0x6d   : > { %s1782_s16 = scalar_lea.hbm %s2415_s5, 32 }
  0x6e   : > { %p1783_p1 = scmp.ne.s32.totalorder %s2415_s5, %s1782_s16  ;;  %p1789_p12 = scmp.lt.u32.totalorder %s1782_s16, %s2415_s5 }
  0x70   : > { %p1785_p3 = pnand %p1783_p1, %p2030_p8 }
  0x72   : > { %p1786_p11 = pneg %p1785_p3 }
  0x74   : > { %p1791_p13 = pnand %p1789_p12, %p1786_p11 }
  0x76   : > { %1794 = shalt.err (!%p1791_p13)
}
  0x77   : > { %s1795_s30 = scalar_lea.vmem %s273_s15, 32  ;;  %p1803_p7 = scmp.lt.s32.totalorder %s273_s15, %s273_s15 }
  0x78   : > { %p1796_p0 = scmp.ne.s32.totalorder %s273_s15, %s1795_s30  ;;  %p1804_p9 = scmp.lt.s32.totalorder %s1795_s30, %s1795_s30 }
  0x7a   : > { %p1798_p2 = pnand %p1796_p0, %p2030_p8  ;;  %p1805_p4 = por %p1804_p9, %p1803_p7 }
  0x7c   : > { %p1799_p5 = pneg %p1798_p2 }
  0x7e   : > { %p1806_p10 = pnand %p1805_p4, %p1799_p5 }
  0x80   : > { %1809 = shalt.err (!%p1806_p10)
}
  0x81   : > { %1499 = dma.hbm_to_vmem [thread:$0]  (!%p2014_p6), %s2415_s5, 32, %s273_s15, [#allocation13]  }
  0x82   : > { %s1320_s20 = sadd.s32 4294967294, %s1918_s29   ;;  %s2134_s12 = sadd.s32 1, %s1918_s29  }
  0x83   : > { %s35_s14 = sadd.s32 1, %s1914_s28  ;;  %s32_s22 = ssub.s32 %s1918_s29, %s2134_s12 }
  0x84   : > { %p42_p8 = scmp.ne.s32.totalorder %s1914_s28, %s1910_s27  ;;  %p33_p1 = scmp.eq.s32.totalorder %s32_s22, 0 }
  0x85   : > { %p43_p3 = scmp.eq.s32.totalorder %s1918_s29, 0  ;;  %p48_p11 = scmp.ne.s32.totalorder %s1910_s27, %s1906_s26 }
  0x86   : > { %p198_p12 = scmp.eq.s32.totalorder %s1998_s8, 1  ;;  %p2424_p0 = scmp.eq.s32.totalorder %s1998_s8, 0 }
  0x87   : > { %s2146_s23 = scalar_select %p33_p1, %s1914_s28, %s35_s14  }
  0x88   : > { %p44_p13 = por %p43_p3, %p42_p8  ;;  %p2150_p2 = por %p2424_p0, %p48_p11 }
  0x89   : > { %p2154_p6 = por %p198_p12, %p42_p8  ;;  %p204_p5 = scmp.eq.s32.totalorder %s1320_s20, 1 }
  0x8a   : > { %p1513_p7 = scmp.lt.s32.totalorder %s1918_s29, 2  ;;  %s286_s13 = sand.u32 1, %s1914_s28  }
  0x8b   : > { %s2426_s15 = scalar_select %p2154_p6, 1, 0 }
  0x8c   : > { %p2160_p9 = por %p204_p5, %p48_p11  ;;  %s1328_s17 = sshll.u32 %s286_s13, 6 }
  0x8d   : > { %s1394_s18 = sshll.u32 %s1918_s29, 10  ;;  %s290_s10 = scalar_lea.vmem [#allocation3], %s1328_s17 }
  0x8e   : > { %s2427_s16 = scalar_select %p2160_p9, 1, 0 }
  0x8f   : > { %s2168_s30 = scalar_lea.hbm %s2410_s0, %s1394_s18  ;;  %s297_s11 = sshll.u32 %s290_s10, 4  ;;  %s2174_s11 = int_to_ptr.vmem [resolvable:$true] %s297_s11 }
  0x90   : > { %p2170_p4 = pnand %p1513_p7, %p44_p13  ;;  %s2176_s14 = scalar_lea.sflag [#allocation4], %s286_s13 }
  0x91   : > { %s1810_s22 = scalar_lea.hbm %s2168_s30, 1024  ;;  %s1815_s19 = scalar_lea.hbm %s2410_s0, 2048 }
  0x92   : > { %p1811_p10 = scmp.ne.s32.totalorder %s2168_s30, %s1810_s22  ;;  %p1812_p8 = pneg %p2170_p4 }
  0x93   : > { %p1816_p11 = scmp.lt.u32.totalorder %s2168_s30, %s2410_s0  ;;  %p1817_p12 = scmp.lt.u32.totalorder %s1815_s19, %s1810_s22 }
  0x94   : > { %p1813_p1 = pnand %p1812_p8, %p1811_p10  ;;  %p1819_p0 = scmp.lt.u32.totalorder %s1810_s22, %s2168_s30 }
  0x95   : > { %p1818_p13 = por %p1817_p12, %p1816_p11 }
  0x96   : > { %p1814_p3 = pneg %p1813_p1 }
  0x97   : > { %p1820_p5 = por %p1819_p0, %p1818_p13 }
  0x99   : > { %p1821_p7 = pnand %p1820_p5, %p1814_p3 }
  0x9b   : > { %1824 = shalt.err (!%p1821_p7)
}
  0x9c   : > { %s1825_s13 = scalar_lea.vmem %s2174_s11, 1024  ;;  %s1929_s17 = smov [#allocation3]  }
  0x9d   : > { %p1826_p10 = scmp.ne.s32.totalorder %s2174_s11, %s1825_s13  ;;  %s1830_s18 = sshll.u32 %s1929_s17, 4  ;;  %s1831_s18 = int_to_ptr.vmem [resolvable:$false] %s1830_s18 }
  0x9e   : > { %s1832_s21 = scalar_lea.vmem %s1831_s18, 2048  ;;  %p1833_p6 = scmp.lt.s32.totalorder %s2174_s11, %s1831_s18 }
  0x9f   : > { %p1828_p1 = pnand %p1826_p10, %p1812_p8  ;;  %p1834_p11 = scmp.lt.s32.totalorder %s1832_s21, %s1825_s13 }
  0xa1   : > { %p1829_p9 = pneg %p1828_p1  ;;  %p1835_p12 = por %p1834_p11, %p1833_p6 }
  0xa3   : > { %p1836_p13 = pnand %p1835_p12, %p1829_p9 }
  0xa5   : > { %1839 = shalt.err (!%p1836_p13)
}
  0xa6   : > { %1503 = dma.hbm_to_vmem [thread:$0]  (!%p2170_p4), %s2168_s30, 1024, %s2174_s11, %s2176_s14, %s1923_s24, %s1923_s24, %s1924_s25  }
  0xa7   : > { %p2429_p8 = scmp.ne.s32.totalorder %s2421_s9, 0 }
  0xa8   : > { %s2210_s22 = sand.u32 (!%p2429_p8), 1, %s1910_s27  }
  0xa9   : > { %309 = sbr.rel (%p2429_p8) target bundleno = 1025 (0x401), region = 48  ;;  %s1332_s19 = sshll.u32 (!%p2429_p8), %s2210_s22, 6 }
  0xaa   : > { %s312_s10 = scalar_lea.sflag (!%p2429_p8), [#allocation4], %s2210_s22  ;;  %s2214_s13 = scalar_lea.vmem (!%p2429_p8), [#allocation3], %s1332_s19 }
  0xb0   : > { %1885 = dma.done.wait (%p2150_p2), %s312_s10, 1024  }
  0xb1   : > { %1887 = vsyncadd (%p2150_p2), %s312_s10, 4294966272  ;;  %p2430_p6 = scmp.eq.s32.totalorder %s1998_s8, 0 }
  0xb3   : > { %1889 = dma.done.wait (%p2430_p6), [#allocation7], 1040   ;;  %p2431_p9 = pmov %p2430_p6 }
  0xb4   : > { %p2432_p4 = pmov %p2430_p6 }
  0xb5   : > { %1891 = vsyncadd (%p2431_p9), [#allocation7], 4294966256 }
  0xb6   : > { %1893 = dma.done.wait (%p2432_p4), [#allocation10], 2080   ;;  %p2433_p3 = pmov %p2432_p4 }
  0xb8   : > { %1895 = vsyncadd (%p2433_p3), [#allocation10], 4294965216  ;;  %p2434_p0 = pmov %p2433_p3 }
  0xba   : > { %1897 = dma.done.wait (%p2434_p0), [#allocation13], 32   ;;  %p2435_p5 = pmov %p2434_p0 }
  0xbb   : > { %v1566_v1 = vld [vmem:[#allocation6] sm:$0xff]   ;;  %v1567_v2 = vld [vmem:[#allocation6 + $0x8] sm:$0xff]   ;;  %v1568_v3 = vld [vmem:[#allocation6 + $0x10] sm:$0xff]   ;;  %v1930_v33 = vmov 0   ;;  %s1338_s9 = sshll.u32 %s2210_s22, 7  ;;  %s1395_s25 = sshll.u32 %s1998_s8, 11 }
  0xbc   : > { %1899 = vsyncadd (%p2435_p5), [#allocation13], 4294967264  ;;  %1412 = vmatprep.subr.bf16.mxu0 %v1566_v1  ;;  %v1569_v4 = vld [vmem:[#allocation6 + $0x18] sm:$0xff]   ;;  %v1574_v5 = vld [vmem:[%s2214_s13] sm:$0xff]   ;;  %785 = vmatprep.mubr.bf16.mxu1 %v1930_v33  ;;  %s2341_s24 = scalar_lea.vmem [#allocation14], %s1338_s9  ;;  %s2362_s20 = scalar_lea.hbm %s2417_s7, %s1395_s25 }
  0xbd   : > { %1413 = vmatpush3.bf16.msra.mxu0 %v1566_v1  ;;  %1428 = vmatprep.mubr.bf16.mxu0 %v1574_v5  ;;  %v1570_v6 = vld [vmem:[#allocation6 + $0x20] sm:$0xff]   ;;  %v1571_v7 = vld [vmem:[#allocation6 + $0x28] sm:$0xff]   ;;  %v1572_v11 = vld [vmem:[#allocation6 + $0x30] sm:$0xff]   ;;  %s1199_s6 = sshll.u32 %s2341_s24, 4  ;;  %s1186_s14 = scalar_lea.sflag [#allocation5], %s2210_s22  ;;  %s2364_s6 = int_to_ptr.vmem [resolvable:$true] %s1199_s6 }
  0xbe   : > { %1414 = vmatprep.subr.bf16.mxu0 %v1567_v2  ;;  %v1584_v8 = vld [vmem:[#allocation9 + $0x4] ss:$8 sps:$4 sm:$0xff]   ;;  %v1582_v9 = vld [vmem:[#allocation9] ss:$8 sps:$4 sm:$0xff]   ;;  %v1587_v10 = vld [vmem:[#allocation9 + $0x14] ss:$8 sps:$4 sm:$0xff]   ;;  %1564 = vset.pattern.permute.xlu0 %v1930_v33 }
  0xbf   : > { %1444 = vmatprep.subr.bf16.mxu1 %v1584_v8  ;;  %v1585_v12 = vld [vmem:[#allocation9 + $0x10] ss:$8 sps:$4 sm:$0xff]   ;;  %v1590_v14 = vld [vmem:[#allocation9 + $0x24] ss:$8 sps:$4 sm:$0xff]   ;;  %v1588_v15 = vld [vmem:[#allocation9 + $0x20] ss:$8 sps:$4 sm:$0xff]   ;;  %1565 = vset.pattern.permute.xlu1 %v1930_v33 }
  0xc0   : > { %1452 = vmatpush1.bf16.msra.mxu1 %v1582_v9  ;;  %v1573_v13 = vld [vmem:[#allocation6 + $0x38] sm:$0xff]   ;;  %v1575_v17 = vld [vmem:[%s2214_s13 + $0x8] sm:$0xff]   ;;  %v1576_v19 = vld [vmem:[%s2214_s13 + $0x10] sm:$0xff]   ;;  %s1840_s17 = scalar_lea.vmem %s2364_s6, 2048  ;;  %p2436_p7 = scmp.ne.s32.totalorder %s2426_s15, 0 }
  0xc1   : > { %1415 = vmatpush3.bf16.msra.mxu0 %v1567_v2  ;;  %1445 = vmatprep.subr.bf16.mxu1 %v1587_v10  ;;  %v1593_v16 = vld [vmem:[#allocation9 + $0x34] ss:$8 sps:$4 sm:$0xff]   ;;  %v1591_v18 = vld [vmem:[#allocation9 + $0x30] ss:$8 sps:$4 sm:$0xff]   ;;  %v1596_v20 = vld [vmem:[#allocation9 + $0x44] ss:$8 sps:$4 sm:$0xff]   ;;  %p1841_p2 = scmp.ne.s32.totalorder %s2364_s6, %s1840_s17 }
  0xc2   : > { %1416 = vmatprep.subr.bf16.mxu0 %v1568_v3  ;;  %v1594_v21 = vld [vmem:[#allocation9 + $0x40] ss:$8 sps:$4 sm:$0xff]   ;;  %v1599_v22 = vld [vmem:[#allocation9 + $0x54] ss:$8 sps:$4 sm:$0xff]   ;;  %v1597_v24 = vld [vmem:[#allocation9 + $0x50] ss:$8 sps:$4 sm:$0xff]  }
  0xc3   : > { %v1577_v23 = vld [vmem:[%s2214_s13 + $0x18] sm:$0xff]   ;;  %v1578_v25 = vld [vmem:[%s2214_s13 + $0x20] sm:$0xff]   ;;  %v1579_v26 = vld [vmem:[%s2214_s13 + $0x28] sm:$0xff]   ;;  %p1842_p10 = pnand %p1841_p2, %p2436_p7  ;;  %s1931_s8 = smov [#allocation14]  }
  0xc4   : > { %1453 = vmatpush1.bf16.msra.mxu1 %v1585_v12  ;;  %v1580_v27 = vld [vmem:[%s2214_s13 + $0x30] sm:$0xff]   ;;  %v1581_v28 = vld [vmem:[%s2214_s13 + $0x38] sm:$0xff]   ;;  %v1600_v30 = vld [vmem:[#allocation9 + $0x60] ss:$8 sps:$4 sm:$0xff]   ;;  %s1844_s18 = sshll.u32 %s1931_s8, 4  ;;  %s1845_s18 = int_to_ptr.vmem [resolvable:$false] %s1844_s18 }
  0xc5   : > { %1417 = vmatpush3.bf16.msra.mxu0 %v1568_v3  ;;  %1446 = vmatprep.subr.bf16.mxu1 %v1590_v14  ;;  %v1602_v29 = vld [vmem:[#allocation9 + $0x64] ss:$8 sps:$4 sm:$0xff]   ;;  %v1605_v31 = vld [vmem:[#allocation9 + $0x74] ss:$8 sps:$4 sm:$0xff]   ;;  %v1603_v32 = vld [vmem:[#allocation9 + $0x70] ss:$8 sps:$4 sm:$0xff]   ;;  %p1843_p1 = pneg %p1842_p10  ;;  %p1847_p11 = scmp.lt.s32.totalorder %s2364_s6, %s1845_s18 }
  0xc6   : > { %1418 = vmatprep.subr.bf16.mxu0 %v1569_v4  ;;  %v1339_v34 = vld [vmem:[#allocation8] ss:$0 sm:$0xff]  ;;  %s1846_s21 = scalar_lea.vmem %s1845_s18, 4096 }
  0xc7   : > { %p1848_p12 = scmp.lt.s32.totalorder %s1846_s21, %s1840_s17 }
  0xc8   : > { %1454 = vmatpush1.bf16.msra.mxu1 %v1588_v15 }
  0xc9   : > { %1419 = vmatpush3.bf16.msra.mxu0 %v1569_v4  ;;  %1447 = vmatprep.subr.bf16.mxu1 %v1593_v16  ;;  %p1849_p13 = por %p1848_p12, %p1847_p11 }
  0xca   : > { %1420 = vmatprep.subr.bf16.mxu0 %v1570_v6 }
  0xcb   : > { %p1850_p8 = pnand %p1849_p13, %p1843_p1 }
  0xcc   : > { %1455 = vmatpush1.bf16.msra.mxu1 %v1591_v18 }
  0xcd   : > { %1421 = vmatpush3.bf16.msra.mxu0 %v1570_v6  ;;  %1448 = vmatprep.subr.bf16.mxu1 %v1596_v20 }
  0xce   : > { %1422 = vmatprep.subr.bf16.mxu0 %v1571_v7 }
  0xd0   : > { %1456 = vmatpush1.bf16.msra.mxu1 %v1594_v21 }
  0xd1   : > { %1423 = vmatpush3.bf16.msra.mxu0 %v1571_v7  ;;  %1449 = vmatprep.subr.bf16.mxu1 %v1599_v22 }
  0xd2   : > { %1424 = vmatprep.subr.bf16.mxu0 %v1572_v11 }
  0xd4   : > { %1457 = vmatpush1.bf16.msra.mxu1 %v1597_v24 }
  0xd5   : > { %1425 = vmatpush3.bf16.msra.mxu0 %v1572_v11  ;;  %1450 = vmatprep.subr.bf16.mxu1 %v1602_v29 }
  0xd6   : > { %1426 = vmatprep.subr.bf16.mxu0 %v1573_v13 }
  0xd8   : > { %1458 = vmatpush1.bf16.msra.mxu1 %v1600_v30 }
  0xd9   : > { %1427 = vmatpush3.bf16.msra.mxu0 %v1573_v13  ;;  %1451 = vmatprep.subr.bf16.mxu1 %v1605_v31 }
  0xda   : > { %733 = vmatprep.subr.bf16.mxu0 %v1584_v8 }
  0xdc   : > { %1429 = vmatmul.mubr.bf16.vlgmr.msra.gmra.mrb[0].mxu0 %v1575_v17  ;;  %1459 = vmatpush1.bf16.msra.mxu1 %v1603_v32 }
  0xdd   : > { %1432 = vmatprep.mubr.bf16.mxu0 %v1576_v19  ;;  %734 = vmatpush1.bf16.msra.mxu0 %v1582_v9 }
  0xde   : > { %735 = vmatprep.subr.bf16.mxu0 %v1587_v10 }
  0xe1   : > { %736 = vmatpush1.bf16.msra.mxu0 %v1585_v12 }
  0xe2   : > { %737 = vmatprep.subr.bf16.mxu0 %v1590_v14 }
  0xe4   : > { %1433 = vmatmul.mubr.bf16.gmra.mrb[4].mxu0 %v1577_v23 }
  0xe5   : > { %1436 = vmatprep.mubr.bf16.mxu0 %v1578_v25  ;;  %738 = vmatpush1.bf16.msra.mxu0 %v1588_v15 }
  0xe6   : > { %739 = vmatprep.subr.bf16.mxu0 %v1593_v16 }
  0xe9   : > { %740 = vmatpush1.bf16.msra.mxu0 %v1591_v18 }
  0xea   : > { %741 = vmatprep.subr.bf16.mxu0 %v1596_v20 }
  0xec   : > { %1437 = vmatmul.mubr.bf16.gmra.mrb[8].mxu0 %v1579_v26 }
  0xed   : > { %1440 = vmatprep.mubr.bf16.mxu0 %v1580_v27  ;;  %742 = vmatpush1.bf16.msra.mxu0 %v1594_v21  ;;  %v643_v27 = vlaneseq }
  0xee   : > { %743 = vmatprep.subr.bf16.mxu0 %v1599_v22 }
  0xf1   : > { %744 = vmatpush1.bf16.msra.mxu0 %v1597_v24 }
  0xf2   : > { %745 = vmatprep.subr.bf16.mxu0 %v1602_v29 }
  0xf4   : > { %1441 = vmatmul.mubr.bf16.gmra.mrb[12].mxu0 %v1581_v28  ;;  %v644_v28 = vshrl.u32 %v643_v27, 7 }
  0xf5   : > { %746 = vmatpush1.bf16.msra.mxu0 %v1600_v30  ;;  %765 = vmatprep.mubr.bf16.mxu0 %v1930_v33  ;;  %v641_v30 = vld [vmem:[#allocation11] sm:$0x3] }
  0xf6   : > { %747 = vmatprep.subr.bf16.mxu0 %v1605_v31  ;;  %v645_v29 = vsub.s32 0, %v644_v28  ;;  %v649_v31 = vsub.s32 1, %v644_v28 }
  0xf9   : > { %748 = vmatpush1.bf16.msra.mxu0 %v1603_v32  ;;  %v2250_v32 = vrot.slane %v641_v30, %v645_v29 }
 0x1af   : > { %v1430_v35 = vpop.f32.mrb[0].mxu0 }
 0x1b0   : > { %v547_v36 = vadd.f32 %v1430_v35, %v1339_v34  ;;  %v538_v37 = vpop.f32.mrb[1].mxu0  ;;  %v878_v35 = vld [vmem:[#allocation12] sm:$0x3] }
 0x1b1   : > { %v539_v38 = vadd.f32 %v1339_v34, %v538_v37  ;;  %v1431_v39 = vpop.f32.mrb[2].mxu0 }
 0x1b2   : > { %v550_v40 = vadd.f32 %v1431_v39, %v1339_v34  ;;  %v541_v41 = vpop.f32.mrb[3].mxu0  ;;  %v603_v43 = vmax.f32 %v547_v36, 0.0  ;;  %v2255_v39 = vrot.slane %v878_v35, %v645_v29 }
 0x1b3   : > { %v542_v42 = vadd.f32 %v1339_v34, %v541_v41  ;;  %v601_v45 = vmax.f32 %v539_v38, 0.0  ;;  %v2258_v41 = vrot.slane %v878_v35, %v649_v31 }
 0x1b4   : > { %v604_v44 = vmax.f32 %v550_v40, 0.0 }
 0x1b5   : > { %v602_v46 = vmax.f32 %v542_v42, 0.0 }
 0x1b6   : > { %v618_v47 = vpack.c.bf16 %v604_v44, %v603_v43 }
 0x1b7   : > { %v617_v48 = vpack.c.bf16 %v602_v46, %v601_v45  ;;  %v1434_v49 = vpop.f32.mrb[4].mxu0 }
 0x1b8   : > { %v563_v50 = vadd.f32 %v1434_v49, %v1339_v34  ;;  %v554_v51 = vpop.f32.mrb[5].mxu0 }
 0x1b9   : > { %v555_v52 = vadd.f32 %v1339_v34, %v554_v51  ;;  %v1435_v53 = vpop.f32.mrb[6].mxu0  ;;  %766 = vmatmul.mubr.bf16.vlgmr.msra.gmra.mrb[16].mxu0 %v617_v48 }
 0x1ba   : > { %v566_v54 = vadd.f32 %v1435_v53, %v1339_v34  ;;  %v557_v55 = vpop.f32.mrb[7].mxu0  ;;  %775 = vmatprep.mubr.bf16.mxu0 %v1930_v33  ;;  %v607_v57 = vmax.f32 %v563_v50, 0.0 }
 0x1bb   : > { %v558_v56 = vadd.f32 %v1339_v34, %v557_v55  ;;  %v605_v59 = vmax.f32 %v555_v52, 0.0 }
 0x1bc   : > { %v608_v58 = vmax.f32 %v566_v54, 0.0 }
 0x1bd   : > { %v606_v60 = vmax.f32 %v558_v56, 0.0 }
 0x1be   : > { %v620_v61 = vpack.c.bf16 %v608_v58, %v607_v57 }
 0x1bf   : > { %v619_v62 = vpack.c.bf16 %v606_v60, %v605_v59  ;;  %v1438_v63 = vpop.f32.mrb[8].mxu0 }
 0x1c0   : > { %v579_v0 = vadd.f32 %v1438_v63, %v1339_v34  ;;  %v570_v1 = vpop.f32.mrb[9].mxu0 }
 0x1c1   : > { %776 = vmatmul.mubr.bf16.gmra.mrb[20].mxu0 %v618_v47  ;;  %786 = vmatmul.mubr.bf16.vlgmr.msra.gmra.mrb[0].mxu1 %v619_v62  ;;  %v571_v2 = vadd.f32 %v1339_v34, %v570_v1  ;;  %v1439_v3 = vpop.f32.mrb[10].mxu0 }
 0x1c2   : > { %v611_v4 = vmax.f32 %v579_v0, 0.0  ;;  %v582_v5 = vadd.f32 %v1439_v3, %v1339_v34  ;;  %v573_v6 = vpop.f32.mrb[11].mxu0  ;;  %795 = vmatprep.mubr.bf16.mxu1 %v1930_v33 }
 0x1c3   : > { %v609_v7 = vmax.f32 %v571_v2, 0.0  ;;  %v574_v8 = vadd.f32 %v1339_v34, %v573_v6 }
 0x1c4   : > { %v612_v9 = vmax.f32 %v582_v5, 0.0 }
 0x1c5   : > { %v610_v10 = vmax.f32 %v574_v8, 0.0 }
 0x1c6   : > { %v622_v11 = vpack.c.bf16 %v612_v9, %v611_v4 }
 0x1c7   : > { %v621_v12 = vpack.c.bf16 %v610_v10, %v609_v7  ;;  %v1442_v13 = vpop.f32.mrb[12].mxu0 }
 0x1c8   : > { %v595_v14 = vadd.f32 %v1442_v13, %v1339_v34  ;;  %v586_v15 = vpop.f32.mrb[13].mxu0 }
 0x1c9   : > { %796 = vmatmul.mubr.bf16.gmra.mrb[4].mxu1 %v620_v61  ;;  %v587_v16 = vadd.f32 %v1339_v34, %v586_v15  ;;  %v1443_v17 = vpop.f32.mrb[14].mxu0 }
 0x1ca   : > { %805 = vmatprep.mubr.bf16.mxu1 %v1930_v33  ;;  %v615_v18 = vmax.f32 %v595_v14, 0.0  ;;  %v598_v19 = vadd.f32 %v1443_v17, %v1339_v34  ;;  %v589_v20 = vpop.f32.mrb[15].mxu0 }
 0x1cb   : > { %v613_v21 = vmax.f32 %v587_v16, 0.0  ;;  %v590_v22 = vadd.f32 %v1339_v34, %v589_v20  ;;  %v2252_v34 = vrot.slane %v641_v30, %v649_v31 }
 0x1cc   : > { %v616_v23 = vmax.f32 %v598_v19, 0.0 }
 0x1cd   : > { %v614_v24 = vmax.f32 %v590_v22, 0.0 }
 0x1ce   : > { %v624_v25 = vpack.c.bf16 %v616_v23, %v615_v18 }
 0x1cf   : > { %v623_v26 = vpack.c.bf16 %v614_v24, %v613_v21 }
 0x1d1   : > { %806 = vmatmul.mubr.bf16.gmra.mrb[8].mxu1 %v621_v12 }
 0x1d2   : > { %815 = vmatprep.mubr.bf16.mxu1 %v1930_v33 }
 0x1d9   : > { %816 = vmatmul.mubr.bf16.gmra.mrb[12].mxu1 %v622_v11 }
 0x1da   : > { %825 = vmatprep.mubr.bf16.mxu1 %v1930_v33 }
 0x1e1   : > { %826 = vmatmul.mubr.bf16.gmra.mrb[16].mxu1 %v623_v26 }
 0x1e2   : > { %835 = vmatprep.mubr.bf16.mxu1 %v1930_v33 }
 0x1e9   : > { %836 = vmatmul.mubr.bf16.gmra.mrb[20].mxu1 %v624_v25 }
 0x28c   : > { %v767_v36 = vpop.f32.mrb[16].mxu0 }
 0x28d   : > { %v768_v37 = vadd.f32 %v767_v36, %v2250_v32  ;;  %v769_v38 = vpop.f32.mrb[17].mxu0 }
 0x28e   : > { %v770_v40 = vadd.f32 %v769_v38, %v2252_v34  ;;  %v771_v33 = vpop.f32.mrb[18].mxu0 }
 0x28f   : > { %v846_v42 = vmax.f32 %v768_v37, 0.0  ;;  %v772_v43 = vadd.f32 %v771_v33, %v2250_v32  ;;  %v773_v44 = vpop.f32.mrb[19].mxu0 }
 0x290   : > { %v847_v45 = vmax.f32 %v770_v40, 0.0  ;;  %v774_v46 = vadd.f32 %v773_v44, %v2252_v34 }
 0x291   : > { %v848_v47 = vmax.f32 %v772_v43, 0.0  ;;  %v890_v48 = vmul.f32 %v2255_v39, %v846_v42 }
 0x292   : > { %v849_v49 = vmax.f32 %v774_v46, 0.0  ;;  %v891_v50 = vmul.f32 %v2258_v41, %v847_v45 }
 0x293   : > { %v892_v51 = vmul.f32 %v2255_v39, %v848_v47 }
 0x294   : > { %v893_v52 = vmul.f32 %v2258_v41, %v849_v49  ;;  %v777_v53 = vpop.f32.mrb[20].mxu0  ;;  %v787_v54 = vpop.f32.mrb[0].mxu1  ;;  %v922_v55 = vadd.f32 %v891_v50, %v890_v48 }
 0x295   : > { %v778_v56 = vadd.f32 %v777_v53, %v2250_v32  ;;  %v788_v57 = vadd.f32 %v787_v54, %v2250_v32  ;;  %v779_v58 = vpop.f32.mrb[21].mxu0  ;;  %v789_v59 = vpop.f32.mrb[1].mxu1 }
 0x296   : > { %v780_v60 = vadd.f32 %v779_v58, %v2252_v34  ;;  %v790_v61 = vadd.f32 %v789_v59, %v2252_v34  ;;  %v781_v62 = vpop.f32.mrb[22].mxu0  ;;  %v791_v63 = vpop.f32.mrb[2].mxu1  ;;  %923 = vadd.xlane.f32.xlu0 %v922_v55  ;;  %v925_v0 = vadd.f32 %v893_v52, %v892_v51 }
 0x297   : > { %v850_v1 = vmax.f32 %v778_v56, 0.0  ;;  %v854_v2 = vmax.f32 %v788_v57, 0.0  ;;  %v782_v3 = vadd.f32 %v781_v62, %v2250_v32  ;;  %v792_v4 = vadd.f32 %v791_v63, %v2250_v32  ;;  %v783_v5 = vpop.f32.mrb[23].mxu0  ;;  %v793_v6 = vpop.f32.mrb[3].mxu1 }
 0x298   : > { %v851_v7 = vmax.f32 %v780_v60, 0.0  ;;  %v855_v8 = vmax.f32 %v790_v61, 0.0  ;;  %v784_v9 = vadd.f32 %v783_v5, %v2252_v34  ;;  %v794_v10 = vadd.f32 %v793_v6, %v2252_v34 }
 0x299   : > { %v898_v11 = vmul.f32 %v2255_v39, %v854_v2  ;;  %v852_v12 = vmax.f32 %v782_v3, 0.0  ;;  %v856_v13 = vmax.f32 %v792_v4, 0.0  ;;  %v894_v14 = vmul.f32 %v2255_v39, %v850_v1 }
 0x29a   : > { %v899_v15 = vmul.f32 %v2258_v41, %v855_v8  ;;  %v853_v16 = vmax.f32 %v784_v9, 0.0  ;;  %v857_v17 = vmax.f32 %v794_v10, 0.0  ;;  %926 = vadd.xlane.f32.xlu0 %v925_v0  ;;  %v895_v18 = vmul.f32 %v2258_v41, %v851_v7 }
 0x29b   : > { %v896_v19 = vmul.f32 %v2255_v39, %v852_v12  ;;  %v900_v20 = vmul.f32 %v2255_v39, %v856_v13 }
 0x29c   : > { %v897_v21 = vmul.f32 %v2258_v41, %v853_v16  ;;  %v901_v22 = vmul.f32 %v2258_v41, %v857_v17  ;;  %v797_v23 = vpop.f32.mrb[4].mxu1  ;;  %v928_v24 = vadd.f32 %v895_v18, %v894_v14  ;;  %v934_v25 = vadd.f32 %v899_v15, %v898_v11 }
 0x29d   : > { %v798_v26 = vadd.f32 %v797_v23, %v2250_v32  ;;  %v799_v27 = vpop.f32.mrb[5].mxu1 }
 0x29e   : > { %v800_v28 = vadd.f32 %v799_v27, %v2252_v34  ;;  %v801_v29 = vpop.f32.mrb[6].mxu1  ;;  %929 = vadd.xlane.f32.xlu1 %v928_v24  ;;  %935 = vadd.xlane.f32.xlu0 %v934_v25  ;;  %v931_v30 = vadd.f32 %v897_v21, %v896_v19  ;;  %v937_v31 = vadd.f32 %v901_v22, %v900_v20 }
 0x29f   : > { %v858_v35 = vmax.f32 %v798_v26, 0.0  ;;  %v802_v36 = vadd.f32 %v801_v29, %v2250_v32  ;;  %v803_v37 = vpop.f32.mrb[7].mxu1 }
 0x2a0   : > { %v859_v38 = vmax.f32 %v800_v28, 0.0  ;;  %v804_v40 = vadd.f32 %v803_v37, %v2252_v34 }
 0x2a1   : > { %v902_v33 = vmul.f32 %v2255_v39, %v858_v35  ;;  %v860_v42 = vmax.f32 %v802_v36, 0.0 }
 0x2a2   : > { %v903_v43 = vmul.f32 %v2258_v41, %v859_v38  ;;  %v861_v44 = vmax.f32 %v804_v40, 0.0  ;;  %932 = vadd.xlane.f32.xlu1 %v931_v30 }
 0x2a3   : > { %v904_v45 = vmul.f32 %v2255_v39, %v860_v42 }
 0x2a4   : > { %v905_v46 = vmul.f32 %v2258_v41, %v861_v44  ;;  %v807_v47 = vpop.f32.mrb[8].mxu1  ;;  %v940_v48 = vadd.f32 %v903_v43, %v902_v33 }
 0x2a5   : > { %v808_v49 = vadd.f32 %v807_v47, %v2250_v32  ;;  %v809_v50 = vpop.f32.mrb[9].mxu1 }
 0x2a6   : > { %v810_v51 = vadd.f32 %v809_v50, %v2252_v34  ;;  %v811_v52 = vpop.f32.mrb[10].mxu1  ;;  %938 = vadd.xlane.f32.xlu1 %v937_v31  ;;  %941 = vadd.xlane.f32.xlu0 %v940_v48  ;;  %v943_v53 = vadd.f32 %v905_v46, %v904_v45 }
 0x2a7   : > { %v862_v54 = vmax.f32 %v808_v49, 0.0  ;;  %v812_v55 = vadd.f32 %v811_v52, %v2250_v32  ;;  %v813_v56 = vpop.f32.mrb[11].mxu1 }
 0x2a8   : > { %v863_v57 = vmax.f32 %v810_v51, 0.0  ;;  %v814_v58 = vadd.f32 %v813_v56, %v2252_v34 }
 0x2a9   : > { %v906_v59 = vmul.f32 %v2255_v39, %v862_v54  ;;  %v864_v60 = vmax.f32 %v812_v55, 0.0 }
 0x2aa   : > { %v907_v61 = vmul.f32 %v2258_v41, %v863_v57  ;;  %v865_v62 = vmax.f32 %v814_v58, 0.0  ;;  %944 = vadd.xlane.f32.xlu1 %v943_v53 }
 0x2ab   : > { %v908_v63 = vmul.f32 %v2255_v39, %v864_v60 }
 0x2ac   : > { %v909_v0 = vmul.f32 %v2258_v41, %v865_v62  ;;  %v817_v1 = vpop.f32.mrb[12].mxu1  ;;  %v946_v2 = vadd.f32 %v907_v61, %v906_v59 }
 0x2ad   : > { %v818_v3 = vadd.f32 %v817_v1, %v2250_v32  ;;  %v819_v4 = vpop.f32.mrb[13].mxu1 }
 0x2ae   : > { %v820_v5 = vadd.f32 %v819_v4, %v2252_v34  ;;  %v821_v6 = vpop.f32.mrb[14].mxu1  ;;  %947 = vadd.xlane.f32.xlu0 %v946_v2  ;;  %v949_v7 = vadd.f32 %v909_v0, %v908_v63 }
 0x2af   : > { %v866_v8 = vmax.f32 %v818_v3, 0.0  ;;  %v822_v9 = vadd.f32 %v821_v6, %v2250_v32  ;;  %v823_v10 = vpop.f32.mrb[15].mxu1 }
 0x2b0   : > { %v867_v11 = vmax.f32 %v820_v5, 0.0  ;;  %v824_v12 = vadd.f32 %v823_v10, %v2252_v34  ;;  %950 = vadd.xlane.f32.xlu1 %v949_v7 }
 0x2b1   : > { %v910_v13 = vmul.f32 %v2255_v39, %v866_v8  ;;  %v868_v14 = vmax.f32 %v822_v9, 0.0 }
 0x2b2   : > { %v911_v15 = vmul.f32 %v2258_v41, %v867_v11  ;;  %v869_v16 = vmax.f32 %v824_v12, 0.0 }
 0x2b3   : > { %v912_v17 = vmul.f32 %v2255_v39, %v868_v14 }
 0x2b4   : > { %v913_v18 = vmul.f32 %v2258_v41, %v869_v16  ;;  %v827_v19 = vpop.f32.mrb[16].mxu1  ;;  %v952_v20 = vadd.f32 %v911_v15, %v910_v13 }
 0x2b5   : > { %v828_v21 = vadd.f32 %v827_v19, %v2250_v32  ;;  %v829_v22 = vpop.f32.mrb[17].mxu1 }
 0x2b6   : > { %v830_v23 = vadd.f32 %v829_v22, %v2252_v34  ;;  %v831_v24 = vpop.f32.mrb[18].mxu1  ;;  %953 = vadd.xlane.f32.xlu0 %v952_v20  ;;  %v955_v25 = vadd.f32 %v913_v18, %v912_v17 }
 0x2b7   : > { %v870_v26 = vmax.f32 %v828_v21, 0.0  ;;  %v832_v27 = vadd.f32 %v831_v24, %v2250_v32  ;;  %v833_v28 = vpop.f32.mrb[19].mxu1 }
 0x2b8   : > { %v871_v29 = vmax.f32 %v830_v23, 0.0  ;;  %v834_v30 = vadd.f32 %v833_v28, %v2252_v34  ;;  %956 = vadd.xlane.f32.xlu1 %v955_v25 }
 0x2b9   : > { %v914_v31 = vmul.f32 %v2255_v39, %v870_v26  ;;  %v872_v35 = vmax.f32 %v832_v27, 0.0 }
 0x2ba   : > { %v915_v36 = vmul.f32 %v2258_v41, %v871_v29  ;;  %v873_v37 = vmax.f32 %v834_v30, 0.0 }
 0x2bb   : > { %v916_v38 = vmul.f32 %v2255_v39, %v872_v35 }
 0x2bc   : > { %v917_v40 = vmul.f32 %v2258_v41, %v873_v37  ;;  %v837_v33 = vpop.f32.mrb[20].mxu1  ;;  %v958_v42 = vadd.f32 %v915_v36, %v914_v31 }
 0x2bd   : > { %v838_v43 = vadd.f32 %v837_v33, %v2250_v32  ;;  %v839_v44 = vpop.f32.mrb[21].mxu1 }
 0x2be   : > { %v840_v45 = vadd.f32 %v839_v44, %v2252_v34  ;;  %v841_v46 = vpop.f32.mrb[22].mxu1  ;;  %959 = vadd.xlane.f32.xlu0 %v958_v42  ;;  %v961_v47 = vadd.f32 %v917_v40, %v916_v38 }
 0x2bf   : > { %v874_v48 = vmax.f32 %v838_v43, 0.0  ;;  %v842_v49 = vadd.f32 %v841_v46, %v2250_v32  ;;  %v843_v50 = vpop.f32.mrb[23].mxu1  ;;  %v2322_v32 = vld [vmem:[#allocation2] ss:$0 sm:$0xff] }
 0x2c0   : > { %v875_v51 = vmax.f32 %v840_v45, 0.0  ;;  %v844_v52 = vadd.f32 %v843_v50, %v2252_v34  ;;  %962 = vadd.xlane.f32.xlu1 %v961_v47 }
 0x2c1   : > { %v918_v53 = vmul.f32 %v2255_v39, %v874_v48  ;;  %v876_v54 = vmax.f32 %v842_v49, 0.0 }
 0x2c2   : > { %v919_v55 = vmul.f32 %v2258_v41, %v875_v51  ;;  %v877_v56 = vmax.f32 %v844_v52, 0.0 }
 0x2c3   : > { %v920_v57 = vmul.f32 %v2255_v39, %v876_v54 }
 0x2c4   : > { %v921_v58 = vmul.f32 %v2258_v41, %v877_v56  ;;  %v964_v59 = vadd.f32 %v919_v55, %v918_v53 }
 0x2c6   : > { %965 = vadd.xlane.f32.xlu0 %v964_v59  ;;  %v967_v60 = vadd.f32 %v921_v58, %v920_v57 }
 0x2c8   : > { %968 = vadd.xlane.f32.xlu1 %v967_v60 }
 0x323   : > { %v924_v61 = vpop.xlane.xlu0 %923 }
 0x324   : > { %v977_v34 = vadd.f32 %v2322_v32, %v924_v61 }
 0x326   : > { %v1373_v62 = vmul.f32 -1.442695, %v977_v34 }
 0x327   : > { %v927_v63 = vpop.xlane.xlu0 %926 }
 0x328   : > { %1606 = vpow2.f32 %v1373_v62  ;;  %v978_v0 = vadd.f32 %v2322_v32, %v927_v63 }
 0x32a   : > { %v1374_v1 = vmul.f32 -1.442695, %v978_v0 }
 0x32b   : > { %v930_v2 = vpop.xlane.xlu1 %929  ;;  %v936_v3 = vpop.xlane.xlu0 %935 }
 0x32c   : > { %1608 = vpow2.f32 %v1374_v1  ;;  %v979_v39 = vadd.f32 %v2322_v32, %v930_v2  ;;  %v981_v41 = vadd.f32 %v2322_v32, %v936_v3 }
 0x32e   : > { %v1375_v4 = vmul.f32 -1.442695, %v979_v39  ;;  %v1377_v5 = vmul.f32 -1.442695, %v981_v41 }
 0x32f   : > { %v933_v6 = vpop.xlane.xlu1 %932 }
 0x330   : > { %1610 = vpow2.f32 %v1375_v4  ;;  %v980_v7 = vadd.f32 %v2322_v32, %v933_v6 }
 0x331   : > { %1612 = vpow2.f32 %v1377_v5 }
 0x332   : > { %v1607_v8 = vpop.eup %1606  ;;  %v1376_v9 = vmul.f32 -1.442695, %v980_v7 }
 0x333   : > { %v1041_v10 = vadd.f32 1.0, %v1607_v8  ;;  %v939_v11 = vpop.xlane.xlu1 %938  ;;  %v942_v12 = vpop.xlane.xlu0 %941 }
 0x334   : > { %1614 = vpow2.f32 %v1376_v9  ;;  %v982_v13 = vadd.f32 %v2322_v32, %v939_v11  ;;  %v983_v14 = vadd.f32 %v2322_v32, %v942_v12 }
 0x335   : > { %1616 = vrcp.f32 %v1041_v10 }
 0x336   : > { %v1609_v15 = vpop.eup %1608  ;;  %v1378_v16 = vmul.f32 -1.442695, %v982_v13  ;;  %v1379_v19 = vmul.f32 -1.442695, %v983_v14 }
 0x337   : > { %v1042_v17 = vadd.f32 1.0, %v1609_v15  ;;  %v945_v18 = vpop.xlane.xlu1 %944 }
 0x338   : > { %1618 = vpow2.f32 %v1378_v16  ;;  %v984_v20 = vadd.f32 %v2322_v32, %v945_v18 }
 0x339   : > { %1620 = vrcp.f32 %v1042_v17 }
 0x33a   : > { %v1611_v21 = vpop.eup %1610  ;;  %1622 = vpow2.f32 %v1379_v19  ;;  %v1380_v25 = vmul.f32 -1.442695, %v984_v20 }
 0x33b   : > { %v1613_v22 = vpop.eup %1612  ;;  %v1043_v23 = vadd.f32 1.0, %v1611_v21  ;;  %v948_v24 = vpop.xlane.xlu0 %947 }
 0x33c   : > { %v985_v26 = vadd.f32 %v2322_v32, %v948_v24  ;;  %v1045_v27 = vadd.f32 1.0, %v1613_v22 }
 0x33d   : > { %1624 = vrcp.f32 %v1043_v23  ;;  %v951_v28 = vpop.xlane.xlu1 %950 }
 0x33e   : > { %v1615_v29 = vpop.eup %1614  ;;  %v986_v30 = vadd.f32 %v2322_v32, %v951_v28  ;;  %1626 = vpow2.f32 %v1380_v25  ;;  %v1381_v35 = vmul.f32 -1.442695, %v985_v26 }
 0x33f   : > { %v1617_v31 = vpop.eup %1616  ;;  %1628 = vrcp.f32 %v1045_v27  ;;  %v1044_v37 = vadd.f32 1.0, %v1615_v29 }
 0x340   : > { %v1382_v36 = vmul.f32 -1.442695, %v986_v30  ;;  %1091 = vperm.xlu0 %1564, %v1617_v31  }
 0x342   : > { %v1619_v38 = vpop.eup %1618  ;;  %1630 = vpow2.f32 %v1382_v36 }
 0x343   : > { %v1621_v40 = vpop.eup %1620  ;;  %v954_v33 = vpop.xlane.xlu0 %953  ;;  %1632 = vpow2.f32 %v1381_v35  ;;  %v1046_v43 = vadd.f32 1.0, %v1619_v38 }
 0x344   : > { %v987_v42 = vadd.f32 %v2322_v32, %v954_v33  ;;  %1096 = vperm.xlu1 %1565, %v1621_v40   ;;  %1634 = vrcp.f32 %v1044_v37  ;;  %v1623_v45 = vpop.eup %1622 }
 0x345   : > { %v957_v44 = vpop.xlane.xlu1 %956  ;;  %v1047_v50 = vadd.f32 1.0, %v1623_v45 }
 0x346   : > { %v1383_v46 = vmul.f32 -1.442695, %v987_v42  ;;  %v988_v47 = vadd.f32 %v2322_v32, %v957_v44 }
 0x347   : > { %v1625_v48 = vpop.eup %1624 }
 0x348   : > { %1636 = vpow2.f32 %v1383_v46  ;;  %v1384_v49 = vmul.f32 -1.442695, %v988_v47  ;;  %1101 = vperm.xlu1 %1565, %v1625_v48   ;;  %v1627_v51 = vpop.eup %1626 }
 0x349   : > { %1638 = vrcp.f32 %v1046_v43  ;;  %v1629_v52 = vpop.eup %1628  ;;  %v1048_v56 = vadd.f32 1.0, %v1627_v51 }
 0x34a   : > { %1640 = vpow2.f32 %v1384_v49 }
 0x34b   : > { %v960_v53 = vpop.xlane.xlu0 %959  ;;  %1642 = vrcp.f32 %v1047_v50 }
 0x34c   : > { %v1631_v54 = vpop.eup %1630  ;;  %v989_v55 = vadd.f32 %v2322_v32, %v960_v53  ;;  %1111 = vperm.xlu1 %1565, %v1629_v52  }
 0x34d   : > { %v1050_v57 = vadd.f32 1.0, %v1631_v54  ;;  %v963_v58 = vpop.xlane.xlu1 %962  ;;  %v1633_v59 = vpop.eup %1632 }
 0x34e   : > { %v1385_v60 = vmul.f32 -1.442695, %v989_v55  ;;  %v990_v61 = vadd.f32 %v2322_v32, %v963_v58  ;;  %v1635_v34 = vpop.eup %1634  ;;  %v1049_v63 = vadd.f32 1.0, %v1633_v59 }
 0x34f   : > { %1644 = vrcp.f32 %v1050_v57 }
 0x350   : > { %1646 = vpow2.f32 %v1385_v60  ;;  %v1386_v62 = vmul.f32 -1.442695, %v990_v61  ;;  %1106 = vperm.xlu1 %1565, %v1635_v34  }
 0x351   : > { %1648 = vrcp.f32 %v1048_v56 }
 0x352   : > { %v1637_v0 = vpop.eup %1636  ;;  %1650 = vpow2.f32 %v1386_v62 }
 0x353   : > { %v1639_v1 = vpop.eup %1638  ;;  %v966_v2 = vpop.xlane.xlu0 %965  ;;  %1652 = vrcp.f32 %v1049_v63  ;;  %v1051_v41 = vadd.f32 1.0, %v1637_v0 }
 0x354   : > { %v1641_v3 = vpop.eup %1640  ;;  %v991_v39 = vadd.f32 %v2322_v32, %v966_v2  ;;  %1116 = vperm.xlu1 %1565, %v1639_v1  }
 0x355   : > { %v1052_v4 = vadd.f32 1.0, %v1641_v3  ;;  %v969_v5 = vpop.xlane.xlu1 %968  ;;  %v1643_v8 = vpop.eup %1642 }
 0x356   : > { %v1387_v6 = vmul.f32 -1.442695, %v991_v39  ;;  %v992_v7 = vadd.f32 %v2322_v32, %v969_v5 }
 0x357   : > { %1654 = vrcp.f32 %v1052_v4 }
 0x358   : > { %1656 = vpow2.f32 %v1387_v6  ;;  %v1388_v9 = vmul.f32 -1.442695, %v992_v7  ;;  %1121 = vperm.xlu1 %1565, %v1643_v8  }
 0x359   : > { %v1645_v10 = vpop.eup %1644  ;;  %1658 = vrcp.f32 %v1051_v41 }
 0x35a   : > { %v1647_v11 = vpop.eup %1646  ;;  %1660 = vpow2.f32 %v1388_v9  ;;  %1136 = vperm.xlu0 %1564, %v1645_v10  }
 0x35b   : > { %v1649_v12 = vpop.eup %1648  ;;  %v1053_v13 = vadd.f32 1.0, %v1647_v11 }
 0x35c   : > { %v1651_v14 = vpop.eup %1650  ;;  %1126 = vperm.xlu1 %1565, %v1649_v12  }
 0x35d   : > { %1662 = vrcp.f32 %v1053_v13  ;;  %v1054_v15 = vadd.f32 1.0, %v1651_v14  ;;  %v1653_v16 = vpop.eup %1652 }
 0x35f   : > { %1664 = vrcp.f32 %v1054_v15 }
 0x360   : > { %1131 = vperm.xlu1 %1565, %v1653_v16  }
 0x361   : > { %v1655_v32 = vpop.eup %1654 }
 0x362   : > { %v1657_v17 = vpop.eup %1656  ;;  %1146 = vperm.xlu0 %1564, %v1655_v32  }
 0x363   : > { %v1659_v18 = vpop.eup %1658  ;;  %v1055_v19 = vadd.f32 1.0, %v1657_v17 }
 0x364   : > { %v1661_v20 = vpop.eup %1660  ;;  %1141 = vperm.xlu1 %1565, %v1659_v18  }
 0x365   : > { %1666 = vrcp.f32 %v1055_v19  ;;  %v1056_v21 = vadd.f32 1.0, %v1661_v20 }
 0x367   : > { %v1663_v22 = vpop.eup %1662  ;;  %1668 = vrcp.f32 %v1056_v21 }
 0x368   : > { %1151 = vperm.xlu1 %1565, %v1663_v22  }
 0x369   : > { %v1665_v23 = vpop.eup %1664 }
 0x36a   : > { %1156 = vperm.xlu0 %1564, %v1665_v23  }
 0x36f   : > { %v1667_v24 = vpop.eup %1666 }
 0x370   : > { %1161 = vperm.xlu1 %1565, %v1667_v24  }
 0x371   : > { %v1669_v25 = vpop.eup %1668 }
 0x372   : > { %1166 = vperm.xlu0 %1564, %v1669_v25  }
 0x3bf   : > { %v1092_v26 = vpop.permute.xlu0 %1091 }
 0x3c0   : > { %1169 = vst [vmem:[%s2341_s24] sm:$0xff] %v1092_v26 }
 0x3c3   : > { %v1097_v27 = vpop.permute.xlu1 %1096 }
 0x3c4   : > { %1170 = vst [vmem:[%s2341_s24 + $0x8] sm:$0xff] %v1097_v27 }
 0x3c7   : > { %v1102_v28 = vpop.permute.xlu1 %1101 }
 0x3c8   : > { %1171 = vst [vmem:[%s2341_s24 + $0x10] sm:$0xff] %v1102_v28 }
 0x3cb   : > { %v1112_v29 = vpop.permute.xlu1 %1111 }
 0x3cc   : > { %1173 = vst [vmem:[%s2341_s24 + $0x20] sm:$0xff] %v1112_v29 }
 0x3cf   : > { %v1107_v30 = vpop.permute.xlu1 %1106 }
 0x3d0   : > { %1172 = vst [vmem:[%s2341_s24 + $0x18] sm:$0xff] %v1107_v30 }
 0x3d3   : > { %v1117_v31 = vpop.permute.xlu1 %1116 }
 0x3d4   : > { %1174 = vst [vmem:[%s2341_s24 + $0x28] sm:$0xff] %v1117_v31 }
 0x3d7   : > { %v1122_v35 = vpop.permute.xlu1 %1121 }
 0x3d8   : > { %1175 = vst [vmem:[%s2341_s24 + $0x30] sm:$0xff] %v1122_v35 }
 0x3d9   : > { %v1137_v36 = vpop.permute.xlu0 %1136 }
 0x3da   : > { %1178 = vst [vmem:[%s2341_s24 + $0x48] sm:$0xff] %v1137_v36 }
 0x3db   : > { %v1127_v37 = vpop.permute.xlu1 %1126 }
 0x3dc   : > { %1176 = vst [vmem:[%s2341_s24 + $0x38] sm:$0xff] %v1127_v37 }
 0x3df   : > { %v1132_v38 = vpop.permute.xlu1 %1131 }
 0x3e0   : > { %1177 = vst [vmem:[%s2341_s24 + $0x40] sm:$0xff] %v1132_v38 }
 0x3e1   : > { %v1147_v40 = vpop.permute.xlu0 %1146 }
 0x3e2   : > { %1180 = vst [vmem:[%s2341_s24 + $0x58] sm:$0xff] %v1147_v40 }
 0x3e3   : > { %v1142_v33 = vpop.permute.xlu1 %1141 }
 0x3e4   : > { %1179 = vst [vmem:[%s2341_s24 + $0x50] sm:$0xff] %v1142_v33 }
 0x3e7   : > { %v1152_v42 = vpop.permute.xlu1 %1151 }
 0x3e8   : > { %1181 = vst [vmem:[%s2341_s24 + $0x60] sm:$0xff] %v1152_v42 }
 0x3e9   : > { %v1157_v43 = vpop.permute.xlu0 %1156 }
 0x3ea   : > { %1182 = vst [vmem:[%s2341_s24 + $0x68] sm:$0xff] %v1157_v43 }
 0x3ef   : > { %v1162_v44 = vpop.permute.xlu1 %1161 }
 0x3f0   : > { %1183 = vst [vmem:[%s2341_s24 + $0x70] sm:$0xff] %v1162_v44 }
 0x3f1   : > { %v1167_v45 = vpop.permute.xlu0 %1166 }
 0x3f2   : > { %1184 = vst [vmem:[%s2341_s24 + $0x78] sm:$0xff] %v1167_v45 }
 0x3f3   : > { %1853 = shalt.err (!%p1850_p8)
}
 0x3f4   : > { %s1854_s19 = scalar_lea.hbm %s2362_s20, 2048  ;;  %s1858_s9 = scalar_lea.hbm %s2417_s7, 4096 }
 0x3f5   : > { %p1855_p6 = scmp.ne.s32.totalorder %s2362_s20, %s1854_s19  ;;  %p1859_p3 = scmp.lt.u32.totalorder %s2362_s20, %s2417_s7 }
 0x3f6   : > { %p1860_p0 = scmp.lt.u32.totalorder %s1858_s9, %s1854_s19  ;;  %p1862_p2 = scmp.lt.u32.totalorder %s1854_s19, %s2362_s20 }
 0x3f7   : > { %p1856_p9 = pnand %p1855_p6, %p2436_p7 }
 0x3f8   : > { %p1861_p5 = por %p1860_p0, %p1859_p3 }
 0x3f9   : > { %p1857_p4 = pneg %p1856_p9 }
 0x3fa   : > { %p1863_p10 = por %p1862_p2, %p1861_p5 }
 0x3fc   : > { %p1864_p1 = pnand %p1863_p10, %p1857_p4 }
 0x3fe   : > { %1867 = shalt.err (!%p1864_p1)
}
 0x3ff   : > { %s1932_s30 = smov 128   ;;  %s1933_s11 = smov 8  }
 0x400   : > { %1482 = dma.vmem_to_hbm [thread:$0]  (%p2436_p7), %s2364_s6, 2048, %s2362_s20, %s1186_s14, %s1932_s30, %s1932_s30, %s1933_s11  }
 0x401 PF: > { %s1214_s17 = sand.u32 1, %s1906_s26   ;;  %p2437_p11 = scmp.ne.s32.totalorder %s2427_s16, 0 }
 0x402   : > { %p2438_p12 = scmp.ge.s32.totalorder %s1918_s29, 2  ;;  %s1215_s8 = scalar_lea.sflag [#allocation5], %s1214_s17 }
 0x404   : > { %p1505_p13 = pnand %p2438_p12, %p2437_p11 }
 0x406   : > { %1901 = dma.done.wait (!%p1505_p13), %s1215_s8, 2048  }
 0x407   : > { %1903 = vsyncadd (!%p1505_p13), %s1215_s8, 4294965248  ;;  %p25_p8 = scmp.ge.s32.totalorder %s2134_s12, 4   ;;  %s2439_s26 = smov %s1910_s27 }
 0x408   : > { %s2440_s27 = smov %s1914_s28  ;;  %s2441_s28 = smov %s2146_s23 }
 0x409   : > { %s2442_s29 = smov %s2134_s12  ;;  %27 = sbr.rel (!%p25_p8) target bundleno = 11 (0xb), region = 113 }
 0x410   :  { %1220 = vsyncpa [#allocation4], 1 }
 0x411   :  { %1222 = vsyncpa [#allocation4 + $0x1], 1 }
 0x412   :  { %1223 = vsyncpa [#allocation7], 1 }
 0x413   :  { %1224 = vsyncpa [#allocation10], 1 }
 0x414   :  { %1225 = vsyncpa [#allocation13], 1 }
 0x415   :  { %1226 = vsyncpa [#allocation5], 1 }
 0x416   :  { %1228 = vsyncpa [#allocation5 + $0x1], 1 }

</bundles_post_ra>
